<compile_context>
chip_gen: v6e
topology: v6e:2x2x1
jax: 0.10.0
libtpu: 0.0.40
codegen_flags: <defaults>
</compile_context>

<pallas_src>
import functools

import jax
import jax.numpy as jnp
from jax.experimental import pallas as pl
from jax.experimental.pallas import tpu as pltpu

EPS = 1e-5


def _round_up(a: int, b: int) -> int:
    return ((a + b - 1) // b) * b


def _split_hi_lo(x_f32):
    """Exact-ish f32 -> (bf16 hi, bf16 lo) split; hi + lo == x to ~2^-16 relative."""
    hi = x_f32.astype(jnp.bfloat16)
    lo = (x_f32 - hi.astype(jnp.float32)).astype(jnp.bfloat16)
    return hi, lo


def _biasfree_ln_kernel_packed(x_ref, w_ref, s_ref, o_ref, *, inv_c: float):
    """Lane-packed tile: x_ref is (TR, Cw) with G = Cw // C original rows per tile-row.

    s_ref is the (Cw, Cw) 0/1 block-diagonal matrix (bf16, exact) with
    S[i, j] = 1 iff i//C == j//C; x @ S gives each C-wide lane group's sum broadcast
    back to every lane of that group.  x is split into bf16 hi/lo so each sum is two
    single-pass bf16 MXU matmuls with f32 accumulation (no HIGH/HIGHEST emulation).
    """
    x = x_ref[...].astype(jnp.float32)
    s = s_ref[...]                                        # (Cw, Cw) bf16 0/1

    x_hi, x_lo = _split_hi_lo(x)
    sum_x = (jnp.dot(x_hi, s, preferred_element_type=jnp.float32)
             + jnp.dot(x_lo, s, preferred_element_type=jnp.float32))

    xx = x * x
    xx_hi, xx_lo = _split_hi_lo(xx)
    sum_x2 = (jnp.dot(xx_hi, s, preferred_element_type=jnp.float32)
              + jnp.dot(xx_lo, s, preferred_element_type=jnp.float32))

    mean = sum_x * inv_c
    var = jnp.maximum(sum_x2 * inv_c - mean * mean, 0.0)   # unbiased=False
    inv = jax.lax.rsqrt(var + EPS)
    w = w_ref[...].astype(jnp.float32)
    # BiasFree: scale only, do NOT subtract the mean.
    o_ref[...] = (x * inv * w).astype(o_ref.dtype)


def _biasfree_ln_kernel_rowwise(x_ref, w_ref, o_ref):
    """Plain per-row reduction (used when C >= 128 or C does not divide 128)."""
    x = x_ref[...].astype(jnp.float32)
    mean = jnp.mean(x, axis=-1, keepdims=True)
    mean_sq = jnp.mean(x * x, axis=-1, keepdims=True)
    var = jnp.maximum(mean_sq - mean * mean, 0.0)
    inv = jax.lax.rsqrt(var + EPS)
    w = w_ref[...].astype(jnp.float32)
    o_ref[...] = (x * inv * w).astype(o_ref.dtype)


def _choose_row_tile(folded: int, cw: int, *, block_bytes: int, min_grid: int) -> int:
    """Rows per block from a byte budget (f32 working set), with enough grid tiles."""
    by_budget = max(8, (block_bytes // (4 * cw)) // 8 * 8)
    by_grid = _round_up(pl.cdiv(folded, min_grid), 8)   # >= min_grid tiles when large
    return max(8, min(by_budget, by_grid))


def biasfree_layernorm(x, weight, *, block_bytes=2 << 20, min_grid=8):
    """BiasFree LayerNorm over the last axis. x: (B, N, C); weight: (C,). Returns (B, N, C)."""
    B, N, C = x.shape
    rows = B * N
    out_dtype = x.dtype

    # Lane-dense packing factor.
    G = (128 // C) if (C < 128 and 128 % C == 0) else 1
    Cw = G * C

    # Bulk path is pad/slice-free; only a ragged row count (rows % G != 0) pays a
    # tiny (<= G-1 row) pad so the lane-fold reshape is exact.
    rows_g = _round_up(rows, G)
    x2 = x.reshape(rows, C)
    if rows_g != rows:
        x2 = jnp.pad(x2, ((0, rows_g - rows), (0, 0)))
    folded = rows_g // G
    xp = x2.reshape(folded, Cw)
    wp = jnp.tile(weight.reshape(1, C).astype(jnp.float32), (1, G))   # (1, Cw)

    rt = _choose_row_tile(folded, Cw, block_bytes=block_bytes, min_grid=min_grid)
    grid = (pl.cdiv(folded, rt),)   # ragged last block handled by Pallas masking

    x_spec = pl.BlockSpec((rt, Cw), lambda i: (i, 0))
    w_spec = pl.BlockSpec((1, Cw), lambda i: (0, 0))
    o_spec = pl.BlockSpec((rt, Cw), lambda i: (i, 0))

    itemsize = jnp.dtype(out_dtype).itemsize
    bytes_io = 2 * rows_g * C * itemsize

    if G > 1:
        seg = jnp.arange(Cw, dtype=jnp.int32) // C
        # 0/1 block-diagonal matrix; bf16 is exact for 0/1 so bf16 MXU passes are exact.
        seg_mat = (seg[:, None] == seg[None, :]).astype(jnp.bfloat16)   # (Cw, Cw)
        kernel = functools.partial(_biasfree_ln_kernel_packed, inv_c=1.0 / C)
        in_specs = [x_spec, w_spec, pl.BlockSpec((Cw, Cw), lambda i: (0, 0))]
        operands = (xp, wp, seg_mat)
        flops = 8 * folded * Cw * Cw + 10 * folded * Cw   # 4 bf16 MXU passes + elementwise
    else:
        kernel = _biasfree_ln_kernel_rowwise
        in_specs = [x_spec, w_spec]
        operands = (xp, wp)
        flops = 10 * folded * Cw

    cost = pl.CostEstimate(
        flops=flops,
        transcendentals=folded * Cw,
        bytes_accessed=bytes_io,
    )

    out = pl.pallas_call(
        kernel,
        out_shape=jax.ShapeDtypeStruct((folded, Cw), out_dtype),
        grid_spec=pltpu.PrefetchScalarGridSpec(
            num_scalar_prefetch=0,
            grid=grid,
            in_specs=in_specs,
            out_specs=o_spec,
        ),
        compiler_params=pltpu.CompilerParams(
            dimension_semantics=("parallel",),
            # Above the 16/32 MiB default scoped limits (v5e/v6e), below v7x's
            # 64 MiB physical VMEM.  2 MiB blocks double-buffered + f32 temporaries
            # fit with plenty of headroom on every generation.
            vmem_limit_bytes=48 << 20,
        ),
        cost_estimate=cost,
    )(*operands)

    out = out.reshape(rows_g, C)
    if rows_g != rows:
        out = out[:rows]
    return out.reshape(B, N, C)


def _reference(x, weight):
    xf = x.astype(jnp.float32)
    mean = jnp.mean(xf, axis=-1, keepdims=True)
    var = jnp.mean((xf - mean) ** 2, axis=-1, keepdims=True)
    return (xf / jnp.sqrt(var + EPS) * weight.astype(jnp.float32)).astype(x.dtype)


if __name__ == "__main__":
    key = jax.random.PRNGKey(0)
    kx, kx2 = jax.random.split(key)

    # Shapes consistent with the module as used in WFormer: tokens (B, H*W, C).
    B, N, C = 2, 64, 32
    x = jax.random.normal(kx, (B, N, C), dtype=jnp.float32)
    # nn.Parameter(torch.ones(C)) with a tiny deterministic perturbation so the
    # scale actually exercises broadcasting.
    weight = jnp.ones((C,), dtype=jnp.float32) + 0.01 * jnp.arange(C, dtype=jnp.float32)

    y = jax.block_until_ready(biasfree_layernorm(x, weight))
    y_ref = _reference(x, weight)
    assert jnp.allclose(y, y_ref, atol=1e-4, rtol=1e-4), "mismatch on main shape"

    # Ragged row count: exercises the fold-pad path and the ragged last grid block
    # (37 rows: not a multiple of the fold factor 4 nor of the row tile).
    x_odd = jax.random.normal(kx2, (1, 37, C), dtype=jnp.float32)
    y_odd = jax.block_until_ready(biasfree_layernorm(x_odd, weight))
    assert jnp.allclose(y_odd, _reference(x_odd, weight), atol=1e-4, rtol=1e-4), \
        "mismatch on padded shape"

    print("KERNEL_OK")
</pallas_src>

<mosaic_0001>
module attributes {stable_mosaic.version = 11 : i64} {
  func.func @_biasfree_ln_kernel_packed(%arg0: i32, %arg1: memref<8x128xf32, #tpu.memory_space<vmem>>, %arg2: memref<1x128xf32, #tpu.memory_space<vmem>>, %arg3: memref<128x128xbf16, #tpu.memory_space<vmem>>, %arg4: memref<8x128xf32, #tpu.memory_space<vmem>>) attributes {dimension_semantics = [#tpu.dimension_semantics<parallel>], iteration_bounds = array<i64: 4>, scalar_prefetch = 0 : i64, scratch_operands = 0 : i64, tpu.core_type = #tpu.core_type<tc>, window_params = [{transform_indices = @transform_0, window_bounds = array<i64: 8, 128>}, {pipeline_mode = #tpu.pipeline_mode<synchronous>, transform_indices = @transform_1, window_bounds = array<i64: 1, 128>}, {pipeline_mode = #tpu.pipeline_mode<synchronous>, transform_indices = @transform_2, window_bounds = array<i64: 128, 128>}, {transform_indices = @transform_3, window_bounds = array<i64: 8, 128>}]} {
    %c0 = arith.constant 0 : index
    %c0_0 = arith.constant 0 : index
    %0 = vector.load %arg1[%c0, %c0_0] : memref<8x128xf32, #tpu.memory_space<vmem>>, vector<8x128xf32>
    %c0_1 = arith.constant 0 : index
    %c0_2 = arith.constant 0 : index
    %1 = vector.load %arg3[%c0_1, %c0_2] : memref<128x128xbf16, #tpu.memory_space<vmem>>, vector<128x128xbf16>
    %2 = arith.truncf %0 : vector<8x128xf32> to vector<8x128xbf16>
    %3 = arith.extf %2 : vector<8x128xbf16> to vector<8x128xf32>
    %4 = arith.subf %0, %3 : vector<8x128xf32>
    %5 = arith.truncf %4 : vector<8x128xf32> to vector<8x128xbf16>
    %cst = arith.constant dense<0.000000e+00> : vector<8x128xf32>
    %6 = tpu.matmul %2, %1, %cst {dimension_numbers = #tpu.dot_dimension_numbers<[1], [0], [0], [1], [0, 0, 1, 1], [], []>} : vector<8x128xbf16>, vector<128x128xbf16>, vector<8x128xf32> -> vector<8x128xf32>
    %cst_3 = arith.constant dense<0.000000e+00> : vector<8x128xf32>
    %7 = tpu.matmul %5, %1, %cst_3 {dimension_numbers = #tpu.dot_dimension_numbers<[1], [0], [0], [1], [0, 0, 1, 1], [], []>} : vector<8x128xbf16>, vector<128x128xbf16>, vector<8x128xf32> -> vector<8x128xf32>
    %8 = arith.addf %6, %7 : vector<8x128xf32>
    %9 = arith.mulf %0, %0 : vector<8x128xf32>
    %10 = arith.truncf %9 : vector<8x128xf32> to vector<8x128xbf16>
    %11 = arith.extf %10 : vector<8x128xbf16> to vector<8x128xf32>
    %12 = arith.subf %9, %11 : vector<8x128xf32>
    %13 = arith.truncf %12 : vector<8x128xf32> to vector<8x128xbf16>
    %cst_4 = arith.constant dense<0.000000e+00> : vector<8x128xf32>
    %14 = tpu.matmul %10, %1, %cst_4 {dimension_numbers = #tpu.dot_dimension_numbers<[1], [0], [0], [1], [0, 0, 1, 1], [], []>} : vector<8x128xbf16>, vector<128x128xbf16>, vector<8x128xf32> -> vector<8x128xf32>
    %cst_5 = arith.constant dense<0.000000e+00> : vector<8x128xf32>
    %15 = tpu.matmul %13, %1, %cst_5 {dimension_numbers = #tpu.dot_dimension_numbers<[1], [0], [0], [1], [0, 0, 1, 1], [], []>} : vector<8x128xbf16>, vector<128x128xbf16>, vector<8x128xf32> -> vector<8x128xf32>
    %16 = arith.addf %14, %15 : vector<8x128xf32>
    %cst_6 = arith.constant 3.125000e-02 : f32
    %17 = vector.broadcast %cst_6 : f32 to vector<8x128xf32>
    %18 = arith.mulf %8, %17 : vector<8x128xf32>
    %cst_7 = arith.constant 3.125000e-02 : f32
    %19 = vector.broadcast %cst_7 : f32 to vector<8x128xf32>
    %20 = arith.mulf %16, %19 : vector<8x128xf32>
    %21 = arith.mulf %18, %18 : vector<8x128xf32>
    %22 = arith.subf %20, %21 : vector<8x128xf32>
    %cst_8 = arith.constant 0.000000e+00 : f32
    %23 = vector.broadcast %cst_8 : f32 to vector<8x128xf32>
    %24 = arith.maximumf %22, %23 : vector<8x128xf32>
    %cst_9 = arith.constant 9.99999974E-6 : f32
    %25 = vector.broadcast %cst_9 : f32 to vector<8x128xf32>
    %26 = arith.addf %24, %25 : vector<8x128xf32>
    %27 = math.rsqrt %26 : vector<8x128xf32>
    %c0_10 = arith.constant 0 : index
    %c0_11 = arith.constant 0 : index
    %28 = vector.load %arg2[%c0_10, %c0_11] : memref<1x128xf32, #tpu.memory_space<vmem>>, vector<1x128xf32>
    %29 = arith.mulf %0, %27 : vector<8x128xf32>
    %30 = vector.broadcast %28 : vector<1x128xf32> to vector<8x128xf32>
    %31 = arith.mulf %29, %30 : vector<8x128xf32>
    %c0_12 = arith.constant 0 : index
    %c0_13 = arith.constant 0 : index
    %32 = vector.load %arg4[%c0_12, %c0_13] : memref<8x128xf32, #tpu.memory_space<vmem>>, vector<8x128xf32>
    tpu.vector_store %arg4[%c0_12, %c0_13], %31 {strides = array<i32>} : memref<8x128xf32, #tpu.memory_space<vmem>>, vector<8x128xf32>,
    return
  }
  func.func @transform_0(%arg0: i32) -> (i32, i32) {
    %c0_i32 = arith.constant 0 : i32
    %c0_i32_0 = arith.constant 0 : i32
    return %arg0, %c0_i32 : i32, i32
  }
  func.func @transform_1(%arg0: i32) -> (i32, i32) {
    %c0_i32 = arith.constant 0 : i32
    %c0_i32_0 = arith.constant 0 : i32
    %c0_i32_1 = arith.constant 0 : i32
    return %c0_i32, %c0_i32_0 : i32, i32
  }
  func.func @transform_2(%arg0: i32) -> (i32, i32) {
    %c0_i32 = arith.constant 0 : i32
    %c0_i32_0 = arith.constant 0 : i32
    %c0_i32_1 = arith.constant 0 : i32
    return %c0_i32, %c0_i32_0 : i32, i32
  }
  func.func @transform_3(%arg0: i32) -> (i32, i32) {
    %c0_i32 = arith.constant 0 : i32
    %c0_i32_0 = arith.constant 0 : i32
    return %arg0, %c0_i32 : i32, i32
  }
}

</mosaic_0001>

<bundles_post_ra>
// kernel: tpu_custom_call.1
= control target key start
LH: loop header
LB: loop body
LE: loop exit
PB: predicated region body
PF: predicated region fallthrough
CT: control target
= control target key end

     0   :  { %8 = vsyncpa [#allocation3], 0  ;;  %s1115_s0 = inlined_call_operand.hbm [shape: f32[32,128], index: 0, kind: input, shape index: {}]   ;;  %s1116_s1 = inlined_call_operand.vmem [shape: f32[1,128], index: 1, kind: input, shape index: {}]   ;;  %s1117_s2 = inlined_call_operand.hbm [shape: bf16[128,128], index: 2, kind: input, shape index: {}]   ;;  %s1118_s3 = inlined_call_operand.hbm [shape: f32[32,128], index: 3, kind: output, shape index: {}]  }
   0x1   :  { %10 = vsyncpa [#allocation3 + $0x1], 0 }
   0x2   :  { %11 = vsyncpa [#allocation6], 0 }
   0x3   :  { %12 = vsyncpa [#allocation4], 0 }
   0x4   :  { %14 = vsyncpa [#allocation4 + $0x1], 0  ;;  %s908_s12 = smov 0   ;;  %s910_s13 = smov 0  }
   0x5   :  { %s912_s14 = smov 0   ;;  %s914_s15 = smov 0  }
   0x6 LB: > { %s929_s16 = sadd.s32 4294967295, %s879_s15   ;;  %s547_s17 = sadd.s32 4294967294, %s879_s15   ;;  %s879_s15 = sphi %s914_s15, %s1139_s15   ;;  %s875_s14 = sphi %s912_s14, %s1138_s14   ;;  %s871_s13 = sphi %s910_s13, %s1137_s13   ;;  %s867_s12 = sphi %s908_s12, %s1136_s12  }
   0x7   : > { %p40_p0 = scmp.ne.s32.totalorder %s871_s13, %s867_s12  ;;  %p1119_p1 = scmp.eq.s32.totalorder %s929_s16, 0 }
   0x8   : > { %p112_p3 = scmp.eq.s32.totalorder %s547_s17, 3  ;;  %p548_p5 = scmp.ge.s32.totalorder %s879_s15, 1 }
   0x9   : > { %p938_p4 = por %p1119_p1, %p40_p0  ;;  %p119_p7 = scmp.lt.s32.totalorder %s879_s15, 5 }
   0xa   : > { %p943_p6 = por %p112_p3, %p40_p0  ;;  %s881_s21 = smov [#allocation5]  }
   0xb   : > { %s1123_s18 = scalar_select %p938_p4, 1, 0 }
   0xc   : > { %s1124_s19 = scalar_select %p943_p6, 1, 0 }
   0xd   : > { %p948_p8 = pnand %p548_p5, %p119_p7  ;;  %s134_s22 = sshll.u32 %s881_s21, 4  ;;  %s135_s22 = int_to_ptr.vmem [resolvable:$true] %s134_s22 }
   0xe   : > { %s961_s24 = sadd.s32 1, %s879_s15   ;;  %s27_s25 = sadd.s32 1, %s875_s14 }
   0xf   : > { %s1125_s20 = scalar_select %p948_p8, 1, 0 }
  0x10   : > { %p694_p9 = pneg %p948_p8  ;;  %s24_s26 = ssub.s32 %s879_s15, %s961_s24 }
  0x11   : > { %s768_s27 = scalar_lea.vmem %s135_s22, 1024  ;;  %p776_p3 = scmp.lt.s32.totalorder %s135_s22, %s135_s22 }
  0x12   : > { %p956_p10 = pnand %p694_p9, %p1119_p1  ;;  %p769_p12 = scmp.ne.s32.totalorder %s135_s22, %s768_s27 }
  0x13   : > { %p777_p5 = scmp.lt.s32.totalorder %s768_s27, %s768_s27 }
  0x14   : > { %p759_p11 = pneg %p956_p10 }
  0x15   : > { %p778_p7 = por %p777_p5, %p776_p3 }
  0x16   : > { %p771_p13 = pnand %p769_p12, %p759_p11 }
  0x18   : > { %p772_p0 = pneg %p771_p13 }
  0x1a   : > { %p779_p2 = pnand %p778_p7, %p772_p0 }
  0x1c   : > { %782 = shalt.err (!%p779_p2)
}
  0x1d   : > { %s882_s28 = smov 64   ;;  %s883_s29 = smov 4  }
  0x1e   : > { %697 = dma.hbm_to_vmem [thread:$0]  (!%p956_p10), %s1117_s2, 1024, %s135_s22, [#allocation6], %s882_s28, %s882_s28, %s883_s29  }
  0x1f   : > { %p25_p9 = scmp.eq.s32.totalorder %s24_s26, 0  ;;  %p34_p11 = scmp.ne.s32.totalorder %s875_s14, %s871_s13 }
  0x20   : > { %p35_p12 = scmp.eq.s32.totalorder %s879_s15, 0  ;;  %p707_p2 = scmp.lt.s32.totalorder %s879_s15, 4 }
  0x21   : > { %s978_s5 = scalar_select %p25_p9, %s875_s14, %s27_s25  }
  0x22   : > { %p36_p13 = por %p35_p12, %p34_p11  ;;  %p1127_p0 = scmp.eq.s32.totalorder %s929_s16, 3 }
  0x23   : > { %s148_s7 = sand.u32 1, %s875_s14   ;;  %s552_s8 = sshll.u32 %s879_s15, 7 }
  0x24   : > { %p982_p3 = por %p1127_p0, %p34_p11  ;;  %s551_s9 = sshll.u32 %s148_s7, 3 }
  0x25   : > { %s991_s17 = scalar_lea.hbm %s1115_s0, %s552_s8  ;;  %s152_s21 = scalar_lea.vmem [#allocation2], %s551_s9 }
  0x26   : > { %s1128_s6 = scalar_select %p982_p3, 1, 0 }
  0x27   : > { %s159_s22 = sshll.u32 %s152_s21, 4  ;;  %p993_p10 = pnand %p707_p2, %p36_p13  ;;  %s160_s22 = int_to_ptr.vmem [resolvable:$true] %s159_s22 }
  0x28   : > { %s149_s25 = scalar_lea.sflag [#allocation3], %s148_s7  ;;  %s783_s26 = scalar_lea.hbm %s991_s17, 128 }
  0x29   : > { %p784_p5 = scmp.ne.s32.totalorder %s991_s17, %s783_s26  ;;  %p785_p7 = pneg %p993_p10 }
  0x2a   : > { %s788_s29 = scalar_lea.hbm %s1115_s0, 512  ;;  %p789_p12 = scmp.lt.s32.totalorder %s991_s17, %s1115_s0 }
  0x2b   : > { %p786_p9 = pnand %p785_p7, %p784_p5  ;;  %p790_p2 = scmp.lt.s32.totalorder %s788_s29, %s783_s26 }
  0x2d   : > { %p787_p11 = pneg %p786_p9  ;;  %p791_p13 = por %p790_p2, %p789_p12 }
  0x2f   : > { %p792_p0 = pnand %p791_p13, %p787_p11 }
  0x31   : > { %795 = shalt.err (!%p792_p0)
}
  0x32   : > { %s796_s8 = scalar_lea.vmem %s160_s22, 128  ;;  %s884_s7 = smov [#allocation2]  }
  0x33   : > { %p797_p1 = scmp.ne.s32.totalorder %s160_s22, %s796_s8  ;;  %s801_s9 = sshll.u32 %s884_s7, 4  ;;  %s802_s9 = int_to_ptr.vmem [resolvable:$false] %s801_s9 }
  0x34   : > { %s803_s10 = scalar_lea.vmem %s802_s9, 256  ;;  %p804_p5 = scmp.lt.s32.totalorder %s160_s22, %s802_s9 }
  0x35   : > { %p799_p6 = pnand %p797_p1, %p785_p7  ;;  %p805_p9 = scmp.lt.s32.totalorder %s803_s10, %s796_s8 }
  0x37   : > { %p800_p3 = pneg %p799_p6  ;;  %p806_p4 = por %p805_p9, %p804_p5 }
  0x39   : > { %p807_p8 = pnand %p806_p4, %p800_p3 }
  0x3b   : > { %810 = shalt.err (!%p807_p8)
}
  0x3c   : > { %701 = dma.hbm_to_vmem [thread:$0]  (!%p993_p10), %s991_s17, 128, %s160_s22, %s149_s25  }
  0x3d   : > { %p1130_p11 = scmp.ne.s32.totalorder %s1125_s20, 0 }
  0x3e   : > { %s1014_s11 = sand.u32 (!%p1130_p11), 1, %s871_s13   ;;  %p1131_p1 = scmp.ne.s32.totalorder (!%p1130_p11), %s1123_s18, 0 }
  0x3f   : > { %168 = sbr.rel (%p1130_p11) target bundleno = 372 (0x174), region = 32  ;;  %s554_s21 = sshll.u32 (!%p1130_p11), %s1014_s11, 3 }
  0x40   : > { %s171_s26 = scalar_lea.sflag (!%p1130_p11), [#allocation3], %s1014_s11  ;;  %s174_s27 = scalar_lea.vmem (!%p1130_p11), [#allocation2], %s554_s21 }
  0x44   : > { %854 = dma.done.wait (%p1131_p1), %s171_s26, 128  }
  0x45   : > { %856 = vsyncadd (%p1131_p1), %s171_s26, 4294967168  ;;  %p1132_p4 = scmp.eq.s32.totalorder %s929_s16, 0 }
  0x47   : > { %858 = dma.done.wait (%p1132_p4), [#allocation6], 1024   ;;  %p1133_p6 = pmov %p1132_p4 }
  0x48   : > { %v885_v0 = vmov 0.0   ;;  %vm886_vm0 = vmmov 0   ;;  %v747_v1 = vld [vmem:[#allocation5 + $0x38] sm:$0xff]   ;;  %v748_v2 = vld [vmem:[#allocation5 + $0x30] sm:$0xff]   ;;  %v749_v3 = vld [vmem:[#allocation5 + $0x28] sm:$0xff]   ;;  %s567_s17 = sshll.u32 %s929_s16, 7 }
  0x49   : > { %860 = vsyncadd (%p1133_p6), [#allocation6], 4294966272  ;;  %606 = vmatprep.subr.bf16.mxu0 %v885_v0  ;;  %626 = vmatprep.subr.bf16.mxu1 %v885_v0  ;;  %v750_v4 = vld [vmem:[#allocation5 + $0x20] sm:$0xff]   ;;  %v751_v5 = vld [vmem:[#allocation5 + $0x18] sm:$0xff]   ;;  %s200_s22 = scalar_lea.vmem [#allocation7], %s554_s21  ;;  %s465_s29 = scalar_lea.hbm %s1118_s3, %s567_s17 }
  0x4a   : > { %622 = vmatprep.mubr.msk.bf16.mxu0 %vm886_vm0, %v885_v0  ;;  %642 = vmatprep.mubr.msk.bf16.mxu1 %vm886_vm0, %v885_v0  ;;  %v1040_v6 = vld [vmem:[%s174_s27] sm:$0xff]  ;;  %v753_v10 = vld [vmem:[#allocation5 + $0x8] sm:$0xff]   ;;  %v754_v12 = vld [vmem:[#allocation5] sm:$0xff]   ;;  %s467_s23 = sshll.u32 %s200_s22, 4  ;;  %s454_s30 = scalar_lea.sflag [#allocation4], %s1014_s11  ;;  %s468_s23 = int_to_ptr.vmem [resolvable:$true] %s467_s23 }
  0x4b   : > { %607 = vmatpush3.bf16.msra.mxu0 %v747_v1  ;;  %627 = vmatpush3.bf16.msra.mxu1 %v747_v1  ;;  %v219_v7 = vpack.c.bf16 %v1040_v6, %v1040_v6  ;;  %v752_v8 = vld [vmem:[#allocation5 + $0x10] sm:$0xff]   ;;  %v351_v14 = vmul.f32 %v1040_v6, %v1040_v6  ;;  %s811_s4 = scalar_lea.vmem %s468_s23, 128  ;;  %p1134_p3 = scmp.ne.s32.totalorder %s1128_s6, 0 }
  0x4c   : > { %608 = vmatprep.subr.bf16.mxu0 %v885_v0  ;;  %628 = vmatprep.subr.bf16.mxu1 %v885_v0  ;;  %v565_v44 = vld [vmem:[%s1116_s1] ss:$0 sm:$0xff]  ;;  %p812_p8 = scmp.ne.s32.totalorder %s468_s23, %s811_s4  ;;  %s887_s8 = smov [#allocation7]  }
  0x4d   : > { %v220_v9 = vunpack.c.l.bf16 %v219_v7  ;;  %v352_v15 = vpack.c.bf16 %v351_v14, %v351_v14  ;;  %s815_s16 = sshll.u32 %s887_s8, 4  ;;  %s816_s16 = int_to_ptr.vmem [resolvable:$false] %s815_s16 }
  0x4e   : > { %p813_p10 = pnand %p812_p8, %p1134_p3  ;;  %s817_s7 = scalar_lea.vmem %s816_s16, 256 }
  0x4f   : > { %609 = vmatpush3.bf16.msra.mxu0 %v748_v2  ;;  %629 = vmatpush3.bf16.msra.mxu1 %v748_v2  ;;  %v221_v11 = vsub.f32 %v1040_v6, %v220_v9  ;;  %v353_v16 = vunpack.c.l.bf16 %v352_v15  ;;  %p818_p12 = scmp.lt.s32.totalorder %s468_s23, %s816_s16  ;;  %p819_p2 = scmp.lt.s32.totalorder %s817_s7, %s811_s4 }
  0x50   : > { %610 = vmatprep.subr.bf16.mxu0 %v885_v0  ;;  %630 = vmatprep.subr.bf16.mxu1 %v885_v0  ;;  %p814_p7 = pneg %p813_p10 }
  0x51   : > { %v222_v13 = vpack.c.bf16 %v221_v11, %v221_v11  ;;  %v354_v17 = vsub.f32 %v351_v14, %v353_v16  ;;  %p820_p13 = por %p819_p2, %p818_p12 }
  0x53   : > { %611 = vmatpush3.bf16.msra.mxu0 %v749_v3  ;;  %631 = vmatpush3.bf16.msra.mxu1 %v749_v3  ;;  %v355_v18 = vpack.c.bf16 %v354_v17, %v354_v17  ;;  %p821_p0 = pnand %p820_p13, %p814_p7 }
  0x54   : > { %612 = vmatprep.subr.bf16.mxu0 %v885_v0  ;;  %632 = vmatprep.subr.bf16.mxu1 %v885_v0 }
  0x57   : > { %613 = vmatpush3.bf16.msra.mxu0 %v750_v4  ;;  %633 = vmatpush3.bf16.msra.mxu1 %v750_v4 }
  0x58   : > { %614 = vmatprep.subr.bf16.mxu0 %v885_v0  ;;  %634 = vmatprep.subr.bf16.mxu1 %v885_v0 }
  0x5b   : > { %615 = vmatpush3.bf16.msra.mxu0 %v751_v5  ;;  %635 = vmatpush3.bf16.msra.mxu1 %v751_v5 }
  0x5c   : > { %616 = vmatprep.subr.bf16.mxu0 %v885_v0  ;;  %636 = vmatprep.subr.bf16.mxu1 %v885_v0 }
  0x5f   : > { %617 = vmatpush3.bf16.msra.mxu0 %v752_v8  ;;  %637 = vmatpush3.bf16.msra.mxu1 %v752_v8 }
  0x60   : > { %618 = vmatprep.subr.bf16.mxu0 %v885_v0  ;;  %638 = vmatprep.subr.bf16.mxu1 %v885_v0 }
  0x63   : > { %619 = vmatpush3.bf16.msra.mxu0 %v753_v10  ;;  %639 = vmatpush3.bf16.msra.mxu1 %v753_v10 }
  0x64   : > { %620 = vmatprep.subr.bf16.mxu0 %v885_v0  ;;  %640 = vmatprep.subr.bf16.mxu1 %v885_v0 }
  0x67   : > { %621 = vmatpush3.bf16.msra.mxu0 %v754_v12  ;;  %641 = vmatpush3.bf16.msra.mxu1 %v754_v12 }
  0x68   : > { %646 = vmatprep.subr.bf16.mxu0 %v885_v0  ;;  %666 = vmatprep.subr.bf16.mxu1 %v885_v0 }
  0x6a   : > { %623 = vmatmul.mubr.bf16.vlgmr.msra.gmra.mxu0 %v222_v13  ;;  %643 = vmatmul.mubr.bf16.vlgmr.msra.gmra.mxu1 %v219_v7 }
  0x6b   : > { %647 = vmatpush3.bf16.msra.mxu0 %v747_v1  ;;  %667 = vmatpush3.bf16.msra.mxu1 %v747_v1 }
  0x6c   : > { %648 = vmatprep.subr.bf16.mxu0 %v885_v0  ;;  %668 = vmatprep.subr.bf16.mxu1 %v885_v0 }
  0x6d   : > { %662 = vmatprep.mubr.msk.bf16.mxu0 %vm886_vm0, %v885_v0  ;;  %682 = vmatprep.mubr.msk.bf16.mxu1 %vm886_vm0, %v885_v0 }
  0x6f   : > { %649 = vmatpush3.bf16.msra.mxu0 %v748_v2  ;;  %669 = vmatpush3.bf16.msra.mxu1 %v748_v2 }
  0x70   : > { %650 = vmatprep.subr.bf16.mxu0 %v885_v0  ;;  %670 = vmatprep.subr.bf16.mxu1 %v885_v0 }
  0x73   : > { %651 = vmatpush3.bf16.msra.mxu0 %v749_v3  ;;  %671 = vmatpush3.bf16.msra.mxu1 %v749_v3 }
  0x74   : > { %652 = vmatprep.subr.bf16.mxu0 %v885_v0  ;;  %672 = vmatprep.subr.bf16.mxu1 %v885_v0 }
  0x77   : > { %653 = vmatpush3.bf16.msra.mxu0 %v750_v4  ;;  %673 = vmatpush3.bf16.msra.mxu1 %v750_v4 }
  0x78   : > { %654 = vmatprep.subr.bf16.mxu0 %v885_v0  ;;  %674 = vmatprep.subr.bf16.mxu1 %v885_v0 }
  0x7b   : > { %655 = vmatpush3.bf16.msra.mxu0 %v751_v5  ;;  %675 = vmatpush3.bf16.msra.mxu1 %v751_v5 }
  0x7c   : > { %656 = vmatprep.subr.bf16.mxu0 %v885_v0  ;;  %676 = vmatprep.subr.bf16.mxu1 %v885_v0 }
  0x7f   : > { %657 = vmatpush3.bf16.msra.mxu0 %v752_v8  ;;  %677 = vmatpush3.bf16.msra.mxu1 %v752_v8 }
  0x80   : > { %658 = vmatprep.subr.bf16.mxu0 %v885_v0  ;;  %678 = vmatprep.subr.bf16.mxu1 %v885_v0 }
  0x83   : > { %659 = vmatpush3.bf16.msra.mxu0 %v753_v10  ;;  %679 = vmatpush3.bf16.msra.mxu1 %v753_v10 }
  0x84   : > { %660 = vmatprep.subr.bf16.mxu0 %v885_v0  ;;  %680 = vmatprep.subr.bf16.mxu1 %v885_v0 }
  0x87   : > { %661 = vmatpush3.bf16.msra.mxu0 %v754_v12  ;;  %681 = vmatpush3.bf16.msra.mxu1 %v754_v12 }
  0x8a   : > { %663 = vmatmul.mubr.bf16.vlgmr.msra.gmra.mxu0 %v355_v18  ;;  %683 = vmatmul.mubr.bf16.vlgmr.msra.gmra.mxu1 %v352_v15 }
 0x12a   : > { %v305_v19 = vpop.f32.mrf.mxu0  ;;  %v345_v20 = vpop.f32.mrf.mxu1 }
 0x12b   : > { %v346_v27 = vadd.f32 %v345_v20, %v305_v19 }
 0x12c   : > { %v624_v21 = vpop.f32.mrf.mxu0  ;;  %v644_v22 = vpop.f32.mrf.mxu1 }
 0x12d   : > { %v436_v28 = vmul.f32 0.03125, %v346_v27 }
 0x12e   : > { %v308_v23 = vpop.f32.mrf.mxu0  ;;  %v348_v24 = vpop.f32.mrf.mxu1 }
 0x12f   : > { %v438_v34 = vmul.f32 %v436_v28, %v436_v28 }
 0x130   : > { %v625_v25 = vpop.f32.mrf.mxu0  ;;  %v645_v26 = vpop.f32.mrf.mxu1 }
 0x14a   : > { %v390_v29 = vpop.f32.mrf.mxu0  ;;  %v430_v30 = vpop.f32.mrf.mxu1 }
 0x14b   : > { %v431_v31 = vadd.f32 %v430_v30, %v390_v29 }
 0x14c   : > { %v664_v32 = vpop.f32.mrf.mxu0  ;;  %v684_v33 = vpop.f32.mrf.mxu1 }
 0x14d   : > { %v437_v35 = vmul.f32 0.03125, %v431_v31 }
 0x14e   : > { %v393_v36 = vpop.f32.mrf.mxu0  ;;  %v433_v37 = vpop.f32.mrf.mxu1 }
 0x14f   : > { %v439_v38 = vsub.f32 %v437_v35, %v438_v34 }
 0x150   : > { %v665_v39 = vpop.f32.mrf.mxu0  ;;  %v685_v40 = vpop.f32.mrf.mxu1 }
 0x151   : > { %v440_v41 = vmax.f32 %v439_v38, 0.0 }
 0x153   : > { %v441_v42 = vadd.f32 1e-05, %v440_v41 }
 0x155   : > { %755 = vrsqrt.f32 %v441_v42 }
 0x162   : > { %v756_v43 = vpop.eup %755 }
 0x163   : > { %v444_v45 = vmul.f32 %v756_v43, %v1040_v6 }
 0x165   : > { %v451_v46 = vmul.f32 %v565_v44, %v444_v45 }
 0x167   : > { %452 = vst [vmem:[%s200_s22] sm:$0xff] %v451_v46 }
 0x168   : > { %824 = shalt.err (!%p821_p0)
}
 0x169   : > { %s825_s9 = scalar_lea.hbm %s465_s29, 128  ;;  %s829_s21 = scalar_lea.hbm %s1118_s3, 512 }
 0x16a   : > { %p826_p5 = scmp.ne.s32.totalorder %s465_s29, %s825_s9  ;;  %p830_p1 = scmp.lt.s32.totalorder %s465_s29, %s1118_s3 }
 0x16b   : > { %p831_p4 = scmp.lt.s32.totalorder %s829_s21, %s825_s9 }
 0x16c   : > { %p827_p9 = pnand %p826_p5, %p1134_p3 }
 0x16d   : > { %p832_p6 = por %p831_p4, %p830_p1 }
 0x16e   : > { %p828_p11 = pneg %p827_p9 }
 0x170   : > { %p833_p8 = pnand %p832_p6, %p828_p11 }
 0x172   : > { %836 = shalt.err (!%p833_p8)
}
 0x173   : > { %692 = dma.vmem_to_hbm [thread:$0]  (%p1134_p3), %s468_s23, 128, %s465_s29, %s454_s30  }
 0x174 PF: > { %p709_p10 = scmp.ge.s32.totalorder %s879_s15, 2  ;;  %s479_s18 = sand.u32 1, %s867_s12  }
 0x175   : > { %p1135_p7 = scmp.ne.s32.totalorder %s1124_s19, 0  ;;  %s480_s20 = scalar_lea.sflag [#allocation4], %s479_s18 }
 0x177   : > { %p703_p12 = pnand %p709_p10, %p1135_p7 }
 0x179   : > { %p704_p2 = pneg %p703_p12 }
 0x17b   : > { %862 = dma.done.wait (%p704_p2), %s480_s20, 128  }
 0x17c   : > { %864 = vsyncadd (%p704_p2), %s480_s20, 4294967168  ;;  %p17_p13 = scmp.ge.s32.totalorder %s961_s24, 6   ;;  %s1136_s12 = smov %s871_s13 }
 0x17d   : > { %s1137_s13 = smov %s875_s14  ;;  %s1138_s14 = smov %s978_s5 }
 0x17e   : > { %s1139_s15 = smov %s961_s24  ;;  %19 = sbr.rel (!%p17_p13) target bundleno = 6 (0x6), region = 81 }
 0x183   :  { %485 = vsyncpa [#allocation3], 1 }
 0x184   :  { %487 = vsyncpa [#allocation3 + $0x1], 1 }
 0x185   :  { %488 = vsyncpa [#allocation6], 1 }
 0x186   :  { %489 = vsyncpa [#allocation4], 1 }
 0x187   :  { %491 = vsyncpa [#allocation4 + $0x1], 1 }

</bundles_post_ra>
